<compile_context>
chip_gen: v6e
topology: v6e:2x2x1
jax: 0.10.0
libtpu: 0.0.40
codegen_flags: <defaults>
</compile_context>

<pallas_src>
import jax
import jax.numpy as jnp
from jax.experimental import pallas as pl
from jax.experimental.pallas import tpu as pltpu


def ccf_pallas(en_feat, de_feat, params):
    B, ch1, H, W = en_feat.shape
    ch2 = de_feat.shape[1]
    cin = ch1 + ch2
    L = H * W

    # NCHW flatten(2) is a pure reshape (no HBM transpose / pad passes).
    en_flat = en_feat.reshape(B, ch1, L)
    de_flat = de_feat.reshape(B, ch2, L)

    # --- static weight preprocessing (trace time, tiny) ------------------------
    # Both Conv1d's (kernel size == full length) collapse to Frobenius products with
    # the single Gram g = de @ en^T  (ch2, ch1).  Pre-transpose the en weight so both
    # contract against the SAME g (no second Gram matmul in the kernel).
    w_en_t = jnp.transpose(params["w_en"], (0, 2, 1))                 # (ch1, ch2, ch1)
    w_comb = jnp.concatenate([w_en_t, params["w_de"]], axis=0)        # (cin, ch2, ch1)
    b_comb = jnp.concatenate([params["b_en"], params["b_de"]])[None]  # (1, cin)

    # Fold BatchNorm (eval) into the conv weights / bias.
    bn_scale = params["bn_gamma"] / jnp.sqrt(params["bn_var"] + 1e-5)
    bn_shift = params["bn_beta"] - params["bn_mean"] * bn_scale
    w_conv_bn = params["w_conv"] * bn_scale[:, None, None, None]      # (ch1, cin, 3, 3)
    # (O, I, ky, kx) -> (O, ky, kx, I) -> (O, 9*I); column index = tap*cin + c.
    w_all = jnp.transpose(w_conv_bn, (0, 2, 3, 1)).reshape(ch1, 9 * cin)
    bias_fold = (params["b_conv"] * bn_scale + bn_shift)[:, None]     # (ch1, 1)

    # Column-validity masks for the left/right taps (handle the x-wrap of the
    # flattened spatial axis; the y halo is handled by in-kernel zero lane-padding).
    col = jnp.arange(L, dtype=jnp.int32) % W
    masks = jnp.stack([(col >= 1).astype(jnp.float32),
                       (col <= W - 2).astype(jnp.float32)], axis=0)   # (2, L)

    # --- fused kernel (one grid step per batch element) ------------------------
    def kernel(en_ref, de_ref, wcomb_ref, bcomb_ref, wall_ref, bias_ref, mask_ref,
               o_ref):
        en = en_ref[0]                                   # (ch1, L)
        de = de_ref[0]                                   # (ch2, L)

        # Single Gram matmul on the MXU: g[k, c] = sum_l de[k, l] * en[c, l]
        g = jax.lax.dot_general(de, en, (((1,), (1,)), ((), ())),
                                preferred_element_type=jnp.float32)   # (ch2, ch1)

        # Per-batch channel scales (en_w ++ de_w) = Frobenius products with g + bias.
        # TODO(synk): for large ch1/ch2 switch this tiny VPU contraction to an MXU
        #             matvec on a flattened Gram.
        prod = wcomb_ref[...] * g[None, :, :]            # (cin, ch2, ch1)
        scale_row = prod.sum(axis=2).sum(axis=1)[None, :] + bcomb_ref[...]  # (1, cin)

        # Fold the per-batch channel scales into the 9-tap conv weights (BN already
        # folded in the wrapper) instead of scaling the whole image.
        w_scaled = wall_ref[...] * jnp.concatenate([scale_row] * 9, axis=1)  # (ch1, 9*cin)

        # Build the im2col stack on the flat spatial axis (lane-dense, L = H*W).
        x_cat = jnp.concatenate([en, de], axis=0)        # (cin, L)
        zpad = jnp.zeros((x_cat.shape[0], W + 1), jnp.float32)
        xp = jnp.concatenate([zpad, x_cat, zpad], axis=1)  # (cin, L + 2W + 2)
        mask_l = mask_ref[0:1, :]
        mask_r = mask_ref[1:2, :]

        pieces = []
        for dy in range(3):
            for dx in range(3):
                start = (W + 1) + (dy - 1) * W + (dx - 1)
                xt = xp[:, start:start + L]              # (cin, L)
                if dx == 0:
                    xt = xt * mask_l
                elif dx == 2:
                    xt = xt * mask_r
                pieces.append(xt)
        x_im2col = jnp.concatenate(pieces, axis=0)       # (9*cin, L)

        # One MXU matmul replaces the 18 tiny K=4 matmuls: (ch1, 9*cin) @ (9*cin, L).
        out = jax.lax.dot_general(w_scaled, x_im2col, (((1,), (0,)), ((), ())),
                                  preferred_element_type=jnp.float32)  # (ch1, L)
        o_ref[0] = jnp.maximum(out + bias_ref[...], 0.0)

    out_flat = pl.pallas_call(
        kernel,
        out_shape=jax.ShapeDtypeStruct((B, ch1, L), jnp.float32),
        grid=(B,),
        in_specs=[
            pl.BlockSpec((1, ch1, L), lambda b: (b, 0, 0)),
            pl.BlockSpec((1, ch2, L), lambda b: (b, 0, 0)),
            pl.BlockSpec((cin, ch2, ch1), lambda b: (0, 0, 0)),
            pl.BlockSpec((1, cin), lambda b: (0, 0)),
            pl.BlockSpec((ch1, 9 * cin), lambda b: (0, 0)),
            pl.BlockSpec((ch1, 1), lambda b: (0, 0)),
            pl.BlockSpec((2, L), lambda b: (0, 0)),
        ],
        out_specs=pl.BlockSpec((1, ch1, L), lambda b: (b, 0, 0)),
        compiler_params=pltpu.CompilerParams(
            dimension_semantics=("parallel",)),
    )(en_flat, de_flat, w_comb, b_comb, w_all, bias_fold, masks)

    return out_flat.reshape(B, ch1, H, W)   # free reshape back to NCHW


# ----------------------------------------------------------------------------
# Pure-JAX reference (mirrors the PyTorch forward exactly)
# ----------------------------------------------------------------------------
def ccf_reference(en_feat, de_feat, params):
    B, ch1, H, W = en_feat.shape
    ch2 = de_feat.shape[1]
    en_flat = en_feat.reshape(B, ch1, H * W)
    de_flat = de_feat.reshape(B, ch2, H * W)
    weight = jnp.einsum("bcl,bkl->bck", de_flat, en_flat)            # (B, ch2, ch1)
    en_w = jnp.einsum("ock,bkc->bo", params["w_en"], weight) + params["b_en"]
    de_w = jnp.einsum("ock,bck->bo", params["w_de"], weight) + params["b_de"]
    x = jnp.concatenate([en_feat * en_w[:, :, None, None],
                         de_feat * de_w[:, :, None, None]], axis=1)
    out = jax.lax.conv_general_dilated(
        x, params["w_conv"], (1, 1), "SAME",
        dimension_numbers=("NCHW", "OIHW", "NCHW"))
    out = out + params["b_conv"][None, :, None, None]
    scale = params["bn_gamma"] / jnp.sqrt(params["bn_var"] + 1e-5)
    shift = params["bn_beta"] - params["bn_mean"] * scale
    out = out * scale[None, :, None, None] + shift[None, :, None, None]
    return jnp.maximum(out, 0.0)


if __name__ == "__main__":
    B, ch1, ch2, H, W = 2, 4, 4, 16, 16
    key = jax.random.PRNGKey(0)
    keys = jax.random.split(key, 12)

    en_feat = jax.random.normal(keys[0], (B, ch1, H, W), jnp.float32)
    de_feat = jax.random.normal(keys[1], (B, ch2, H, W), jnp.float32)

    params = {
        # en_conv: Conv1d(ch1, ch1, kernel_size=ch2) -> weight (ch1, ch1, ch2)
        "w_en": 0.05 * jax.random.normal(keys[2], (ch1, ch1, ch2), jnp.float32),
        "b_en": 0.05 * jax.random.normal(keys[3], (ch1,), jnp.float32),
        # de_conv: Conv1d(ch2, ch2, kernel_size=ch1) -> weight (ch2, ch2, ch1)
        "w_de": 0.05 * jax.random.normal(keys[4], (ch2, ch2, ch1), jnp.float32),
        "b_de": 0.05 * jax.random.normal(keys[5], (ch2,), jnp.float32),
        # final conv_block_k3: Conv2d(ch1+ch2, ch1, k=3, pad=1) + BN + ReLU
        "w_conv": 0.1 * jax.random.normal(keys[6], (ch1, ch1 + ch2, 3, 3), jnp.float32),
        "b_conv": 0.1 * jax.random.normal(keys[7], (ch1,), jnp.float32),
        "bn_gamma": 1.0 + 0.1 * jax.random.normal(keys[8], (ch1,), jnp.float32),
        "bn_beta": 0.1 * jax.random.normal(keys[9], (ch1,), jnp.float32),
        "bn_mean": 0.1 * jax.random.normal(keys[10], (ch1,), jnp.float32),
        "bn_var": jnp.abs(1.0 + 0.1 * jax.random.normal(keys[11], (ch1,), jnp.float32)),
    }

    out = jax.block_until_ready(ccf_pallas(en_feat, de_feat, params))
    ref = jax.block_until_ready(ccf_reference(en_feat, de_feat, params))

    assert out.shape == (B, ch1, H, W), out.shape
    assert jnp.allclose(out, ref, rtol=2e-3, atol=1e-2), \
        float(jnp.max(jnp.abs(out - ref)))
    print("KERNEL_OK")
</pallas_src>

<mosaic_0001>
module attributes {stable_mosaic.version = 11 : i64} {
  func.func @kernel(%arg0: i32, %arg1: memref<1x4x256xf32, #tpu.memory_space<vmem>>, %arg2: memref<1x4x256xf32, #tpu.memory_space<vmem>>, %arg3: memref<8x4x4xf32, #tpu.memory_space<vmem>>, %arg4: memref<1x8xf32, #tpu.memory_space<vmem>>, %arg5: memref<4x72xf32, #tpu.memory_space<vmem>>, %arg6: memref<4x1xf32, #tpu.memory_space<vmem>>, %arg7: memref<2x256xf32, #tpu.memory_space<vmem>>, %arg8: memref<1x4x256xf32, #tpu.memory_space<vmem>>) attributes {dimension_semantics = [#tpu.dimension_semantics<parallel>], iteration_bounds = array<i64: 2>, scalar_prefetch = 0 : i64, scratch_operands = 0 : i64, tpu.core_type = #tpu.core_type<tc>, window_params = [{transform_indices = @transform_0, window_bounds = array<i64: 1, 4, 256>}, {transform_indices = @transform_1, window_bounds = array<i64: 1, 4, 256>}, {pipeline_mode = #tpu.pipeline_mode<synchronous>, transform_indices = @transform_2, window_bounds = array<i64: 8, 4, 4>}, {pipeline_mode = #tpu.pipeline_mode<synchronous>, transform_indices = @transform_3, window_bounds = array<i64: 1, 8>}, {pipeline_mode = #tpu.pipeline_mode<synchronous>, transform_indices = @transform_4, window_bounds = array<i64: 4, 72>}, {pipeline_mode = #tpu.pipeline_mode<synchronous>, transform_indices = @transform_5, window_bounds = array<i64: 4, 1>}, {pipeline_mode = #tpu.pipeline_mode<synchronous>, transform_indices = @transform_6, window_bounds = array<i64: 2, 256>}, {transform_indices = @transform_7, window_bounds = array<i64: 1, 4, 256>}]} {
    %c0 = arith.constant 0 : index
    %c0_0 = arith.constant 0 : index
    %c0_1 = arith.constant 0 : index
    %0 = vector.load %arg1[%c0, %c0_0, %c0_1] : memref<1x4x256xf32, #tpu.memory_space<vmem>>, vector<1x4x256xf32>
    %1 = vector.shape_cast %0 : vector<1x4x256xf32> to vector<4x256xf32>
    %c0_2 = arith.constant 0 : index
    %c0_3 = arith.constant 0 : index
    %c0_4 = arith.constant 0 : index
    %2 = vector.load %arg2[%c0_2, %c0_3, %c0_4] : memref<1x4x256xf32, #tpu.memory_space<vmem>>, vector<1x4x256xf32>
    %3 = vector.shape_cast %2 : vector<1x4x256xf32> to vector<4x256xf32>
    %cst = arith.constant dense<0.000000e+00> : vector<4x4xf32>
    %4 = tpu.matmul %3, %1, %cst {dimension_numbers = #tpu.dot_dimension_numbers<[1], [1], [0], [0], [0, 0, 1, 0], [], []>} : vector<4x256xf32>, vector<4x256xf32>, vector<4x4xf32> -> vector<4x4xf32>
    %c0_5 = arith.constant 0 : index
    %c0_6 = arith.constant 0 : index
    %c0_7 = arith.constant 0 : index
    %5 = vector.load %arg3[%c0_5, %c0_6, %c0_7] : memref<8x4x4xf32, #tpu.memory_space<vmem>>, vector<8x4x4xf32>
    %6 = vector.shape_cast %4 : vector<4x4xf32> to vector<1x4x4xf32>
    %7 = vector.broadcast %6 : vector<1x4x4xf32> to vector<8x4x4xf32>
    %8 = arith.mulf %5, %7 : vector<8x4x4xf32>
    %cst_8 = arith.constant dense<0.000000e+00> : vector<8x4xf32>
    %9 = vector.multi_reduction <add>, %8, %cst_8 [2] : vector<8x4x4xf32> to vector<8x4xf32>
    %cst_9 = arith.constant dense<0.000000e+00> : vector<8xf32>
    %10 = vector.multi_reduction <add>, %9, %cst_9 [1] : vector<8x4xf32> to vector<8xf32>
    %11 = vector.shape_cast %10 : vector<8xf32> to vector<1x8xf32>
    %c0_10 = arith.constant 0 : index
    %c0_11 = arith.constant 0 : index
    %12 = vector.load %arg4[%c0_10, %c0_11] : memref<1x8xf32, #tpu.memory_space<vmem>>, vector<1x8xf32>
    %13 = arith.addf %11, %12 : vector<1x8xf32>
    %c0_12 = arith.constant 0 : index
    %c0_13 = arith.constant 0 : index
    %14 = vector.load %arg5[%c0_12, %c0_13] : memref<4x72xf32, #tpu.memory_space<vmem>>, vector<4x72xf32>
    %15 = tpu.concatenate %13, %13, %13, %13, %13, %13, %13, %13, %13 in 1 : vector<1x8xf32>, vector<1x8xf32>, vector<1x8xf32>, vector<1x8xf32>, vector<1x8xf32>, vector<1x8xf32>, vector<1x8xf32>, vector<1x8xf32>, vector<1x8xf32> -> vector<1x72xf32>
    %16 = vector.broadcast %15 : vector<1x72xf32> to vector<4x72xf32>
    %17 = arith.mulf %14, %16 : vector<4x72xf32>
    %18 = tpu.concatenate %1, %3 in 0 : vector<4x256xf32>, vector<4x256xf32> -> vector<8x256xf32>
    %cst_14 = arith.constant 0.000000e+00 : f32
    %19 = vector.broadcast %cst_14 : f32 to vector<8x17xf32>
    %20 = tpu.concatenate %19, %18, %19 in 1 : vector<8x17xf32>, vector<8x256xf32>, vector<8x17xf32> -> vector<8x290xf32>
    %c0_15 = arith.constant 0 : index
    %c0_16 = arith.constant 0 : index
    %21 = vector.load %arg7[%c0_15, %c0_16] : memref<2x256xf32, #tpu.memory_space<vmem>>, vector<1x256xf32>
    %c1 = arith.constant 1 : index
    %c0_17 = arith.constant 0 : index
    %22 = vector.load %arg7[%c1, %c0_17] : memref<2x256xf32, #tpu.memory_space<vmem>>, vector<1x256xf32>
    %23 = vector.extract_strided_slice %20 {offsets = [0, 0], sizes = [8, 256], strides = [1, 1]} : vector<8x290xf32> to vector<8x256xf32>
    %24 = vector.broadcast %21 : vector<1x256xf32> to vector<8x256xf32>
    %25 = arith.mulf %23, %24 : vector<8x256xf32>
    %26 = vector.extract_strided_slice %20 {offsets = [0, 1], sizes = [8, 256], strides = [1, 1]} : vector<8x290xf32> to vector<8x256xf32>
    %27 = vector.extract_strided_slice %20 {offsets = [0, 2], sizes = [8, 256], strides = [1, 1]} : vector<8x290xf32> to vector<8x256xf32>
    %28 = vector.broadcast %22 : vector<1x256xf32> to vector<8x256xf32>
    %29 = arith.mulf %27, %28 : vector<8x256xf32>
    %30 = vector.extract_strided_slice %20 {offsets = [0, 16], sizes = [8, 256], strides = [1, 1]} : vector<8x290xf32> to vector<8x256xf32>
    %31 = vector.broadcast %21 : vector<1x256xf32> to vector<8x256xf32>
    %32 = arith.mulf %30, %31 : vector<8x256xf32>
    %33 = vector.extract_strided_slice %20 {offsets = [0, 17], sizes = [8, 256], strides = [1, 1]} : vector<8x290xf32> to vector<8x256xf32>
    %34 = vector.extract_strided_slice %20 {offsets = [0, 18], sizes = [8, 256], strides = [1, 1]} : vector<8x290xf32> to vector<8x256xf32>
    %35 = vector.broadcast %22 : vector<1x256xf32> to vector<8x256xf32>
    %36 = arith.mulf %34, %35 : vector<8x256xf32>
    %37 = vector.extract_strided_slice %20 {offsets = [0, 32], sizes = [8, 256], strides = [1, 1]} : vector<8x290xf32> to vector<8x256xf32>
    %38 = vector.broadcast %21 : vector<1x256xf32> to vector<8x256xf32>
    %39 = arith.mulf %37, %38 : vector<8x256xf32>
    %40 = vector.extract_strided_slice %20 {offsets = [0, 33], sizes = [8, 256], strides = [1, 1]} : vector<8x290xf32> to vector<8x256xf32>
    %41 = vector.extract_strided_slice %20 {offsets = [0, 34], sizes = [8, 256], strides = [1, 1]} : vector<8x290xf32> to vector<8x256xf32>
    %42 = vector.broadcast %22 : vector<1x256xf32> to vector<8x256xf32>
    %43 = arith.mulf %41, %42 : vector<8x256xf32>
    %44 = tpu.concatenate %25, %26, %29, %32, %33, %36, %39, %40, %43 in 0 : vector<8x256xf32>, vector<8x256xf32>, vector<8x256xf32>, vector<8x256xf32>, vector<8x256xf32>, vector<8x256xf32>, vector<8x256xf32>, vector<8x256xf32>, vector<8x256xf32> -> vector<72x256xf32>
    %cst_18 = arith.constant dense<0.000000e+00> : vector<4x256xf32>
    %45 = tpu.matmul %17, %44, %cst_18 {dimension_numbers = #tpu.dot_dimension_numbers<[1], [0], [0], [1], [0, 0, 1, 1], [], []>} : vector<4x72xf32>, vector<72x256xf32>, vector<4x256xf32> -> vector<4x256xf32>
    %c0_19 = arith.constant 0 : index
    %c0_20 = arith.constant 0 : index
    %46 = vector.load %arg6[%c0_19, %c0_20] : memref<4x1xf32, #tpu.memory_space<vmem>>, vector<4x1xf32>
    %47 = vector.broadcast %46 : vector<4x1xf32> to vector<4x256xf32>
    %48 = arith.addf %45, %47 : vector<4x256xf32>
    %cst_21 = arith.constant 0.000000e+00 : f32
    %49 = vector.broadcast %cst_21 : f32 to vector<4x256xf32>
    %50 = arith.maximumf %48, %49 : vector<4x256xf32>
    %c0_22 = arith.constant 0 : index
    %c0_23 = arith.constant 0 : index
    %c0_24 = arith.constant 0 : index
    %51 = vector.load %arg8[%c0_22, %c0_23, %c0_24] : memref<1x4x256xf32, #tpu.memory_space<vmem>>, vector<1x4x256xf32>
    %52 = vector.shape_cast %51 : vector<1x4x256xf32> to vector<4x256xf32>
    %53 = vector.shape_cast %50 : vector<4x256xf32> to vector<1x4x256xf32>
    tpu.vector_store %arg8[%c0_22, %c0_23, %c0_24], %53 {strides = array<i32>} : memref<1x4x256xf32, #tpu.memory_space<vmem>>, vector<1x4x256xf32>,
    return
  }
  func.func @transform_0(%arg0: i32) -> (i32, i32, i32) {
    %c0_i32 = arith.constant 0 : i32
    %c0_i32_0 = arith.constant 0 : i32
    %c0_i32_1 = arith.constant 0 : i32
    return %arg0, %c0_i32, %c0_i32_0 : i32, i32, i32
  }
  func.func @transform_1(%arg0: i32) -> (i32, i32, i32) {
    %c0_i32 = arith.constant 0 : i32
    %c0_i32_0 = arith.constant 0 : i32
    %c0_i32_1 = arith.constant 0 : i32
    return %arg0, %c0_i32, %c0_i32_0 : i32, i32, i32
  }
  func.func @transform_2(%arg0: i32) -> (i32, i32, i32) {
    %c0_i32 = arith.constant 0 : i32
    %c0_i32_0 = arith.constant 0 : i32
    %c0_i32_1 = arith.constant 0 : i32
    %c0_i32_2 = arith.constant 0 : i32
    return %c0_i32, %c0_i32_0, %c0_i32_1 : i32, i32, i32
  }
  func.func @transform_3(%arg0: i32) -> (i32, i32) {
    %c0_i32 = arith.constant 0 : i32
    %c0_i32_0 = arith.constant 0 : i32
    %c0_i32_1 = arith.constant 0 : i32
    return %c0_i32, %c0_i32_0 : i32, i32
  }
  func.func @transform_4(%arg0: i32) -> (i32, i32) {
    %c0_i32 = arith.constant 0 : i32
    %c0_i32_0 = arith.constant 0 : i32
    %c0_i32_1 = arith.constant 0 : i32
    return %c0_i32, %c0_i32_0 : i32, i32
  }
  func.func @transform_5(%arg0: i32) -> (i32, i32) {
    %c0_i32 = arith.constant 0 : i32
    %c0_i32_0 = arith.constant 0 : i32
    %c0_i32_1 = arith.constant 0 : i32
    return %c0_i32, %c0_i32_0 : i32, i32
  }
  func.func @transform_6(%arg0: i32) -> (i32, i32) {
    %c0_i32 = arith.constant 0 : i32
    %c0_i32_0 = arith.constant 0 : i32
    %c0_i32_1 = arith.constant 0 : i32
    return %c0_i32, %c0_i32_0 : i32, i32
  }
  func.func @transform_7(%arg0: i32) -> (i32, i32, i32) {
    %c0_i32 = arith.constant 0 : i32
    %c0_i32_0 = arith.constant 0 : i32
    %c0_i32_1 = arith.constant 0 : i32
    return %arg0, %c0_i32, %c0_i32_0 : i32, i32, i32
  }
}

</mosaic_0001>

<bundles_post_ra>
// kernel: tpu_custom_call.1
= control target key start
LH: loop header
LB: loop body
LE: loop exit
PB: predicated region body
PF: predicated region fallthrough
CT: control target
= control target key end

     0   :  { %12 = vsyncpa [#allocation3], 0  ;;  %s1388_s0 = inlined_call_operand.vmem [shape: f32[2,4,256], index: 0, kind: input, shape index: {}]   ;;  %s1389_s1 = inlined_call_operand.vmem [shape: f32[2,4,256], index: 1, kind: input, shape index: {}]   ;;  %s1390_s2 = inlined_call_operand.vmem [shape: f32[8,4,4], index: 2, kind: input, shape index: {}]   ;;  %s1391_s3 = inlined_call_operand.vmem [shape: f32[1,8], index: 3, kind: input, shape index: {}]   ;;  %s1392_s4 = inlined_call_operand.vmem [shape: f32[4,72], index: 4, kind: input, shape index: {}]   ;;  %s1393_s5 = inlined_call_operand.vmem [shape: f32[4,1], index: 5, kind: input, shape index: {}]   ;;  %s1394_s6 = inlined_call_operand.vmem [shape: f32[2,256], index: 6, kind: input, shape index: {}]   ;;  %s1395_s7 = inlined_call_operand.hbm [shape: f32[2,4,256], index: 7, kind: output, shape index: {}]  }
   0x1   :  { %14 = vsyncpa [#allocation3 + $0x1], 0  ;;  %s1145_s24 = smov 0   ;;  %s1147_s25 = smov 0  }
   0x2   :  { %s1149_s26 = smov 0   ;;  %s1151_s27 = smov 0  }
   0x3 LB: > { %s1166_s28 = sadd.s32 4294967295, %s1086_s27   ;;  %s947_s29 = sadd.s32 4294967294, %s1086_s27   ;;  %s1086_s27 = sphi %s1151_s27, %s1401_s27   ;;  %s1082_s26 = sphi %s1149_s26, %s1400_s26   ;;  %s1078_s25 = sphi %s1147_s25, %s1399_s25   ;;  %s1074_s24 = sphi %s1145_s24, %s1398_s24  }
   0x4   : > { %s1170_s30 = sadd.s32 1, %s1086_s27   ;;  %s184_s8 = sadd.s32 1, %s1082_s26 }
   0x5   : > { %s181_s9 = ssub.s32 %s1086_s27, %s1170_s30  ;;  %p194_p0 = scmp.ne.s32.totalorder %s1082_s26, %s1078_s25 }
   0x6   : > { %p182_p1 = scmp.eq.s32.totalorder %s181_s9, 0  ;;  %p195_p2 = scmp.eq.s32.totalorder %s1166_s28, 1 }
   0x7   : > { %p200_p3 = scmp.ne.s32.totalorder %s1078_s25, %s1074_s24  ;;  %p201_p4 = scmp.eq.s32.totalorder %s947_s29, 1 }
   0x8   : > { %s1181_s10 = scalar_select %p182_p1, %s1082_s26, %s184_s8  }
   0x9   : > { %p1183_p5 = por %p195_p2, %p194_p0  ;;  %p1187_p6 = por %p201_p4, %p200_p3 }
   0xa   : > { %p950_p7 = scmp.ge.s32.totalorder %s1086_s27, 1  ;;  %p250_p8 = scmp.lt.s32.totalorder %s1086_s27, 3 }
   0xc   : > { %p251_p9 = pnand %p950_p7, %p250_p8 }
   0xd   : > { %p287_p10 = scmp.lt.s32.totalorder (!%p251_p9), %s1166_s28, 1  ;;  %s1088_s8 = smov (!%p251_p9), 17  }
   0xe   : > { %254 = sbr.rel (%p251_p9) target bundleno = 880 (0x370), region = 48  ;;  %s1091_s18 = smov (!%p251_p9), 18  }
   0xf   : > { %s1092_s19 = smov (!%p251_p9), 16   ;;  %s1094_s21 = smov (!%p251_p9), 94  }
  0x10   : > { %s1096_s22 = smov (!%p251_p9), 95   ;;  %s1097_s23 = smov (!%p251_p9), 96  }
  0x11   : > { %s1098_s29 = smov (!%p251_p9), 110   ;;  %s1100_s9 = smov (!%p251_p9), 112  }
  0x12   : > { %s1104_s15 = smov (!%p251_p9), [#allocation2]  }
  0x13   : > { %s288_s13 = scalar_select %p287_p10, %s1166_s28, 1  ;;  %v377_v4 = vld [vmem:[%s1390_s2 + $0x8] sm:$0xf]  ;;  %v375_v5 = vld [vmem:[%s1390_s2] sm:$0xf]  ;;  %vm391_vm0 = vcmask 27648   ;;  %v424_v30 = vlaneseq }
  0x14   : > { %v378_v7 = vld [vmem:[%s1390_s2 + $0xc] sm:$0xf]  ;;  %v376_v8 = vld [vmem:[%s1390_s2 + $0x4] sm:$0xf]  ;;  %v380_v16 = vld [vmem:[%s1390_s2 + $0x14] sm:$0xf] }
  0x15   : > { %s964_s14 = sshll.u32 %s288_s13, 3  ;;  %v379_v17 = vld [vmem:[%s1390_s2 + $0x10] sm:$0xf]  ;;  %v382_v22 = vld [vmem:[%s1390_s2 + $0x1c] sm:$0xf]  ;;  %v1233_v31 = vshrl.u32 %v424_v30, 7 }
  0x16   : > { %s291_s17 = scalar_lea.vmem %s1388_s0, %s964_s14  ;;  %s296_s20 = scalar_lea.vmem %s1389_s1, %s964_s14  ;;  %v381_v23 = vld [vmem:[%s1390_s2 + $0x18] sm:$0xf]  ;;  %vm569_vm1 = vcmask 1043456   ;;  %v957_v35 = vld [vmem:[%s1394_s6 + $0x1] ss:$2 sm:$0x3] }
  0x17   : > { %v297_v0 = vld [vmem:[%s291_s17] sm:$0xff]  ;;  %v1236_v33 = vsub.s32 0, %v1233_v31  ;;  %v595_v37 = vsub.s32 1, %v1233_v31  ;;  %s1089_s14 = smov 34   ;;  %s1090_s17 = smov 32   ;;  %v1263_v44 = vand.u32 127, %v424_v30 }
  0x18   : > { %v298_v1 = vld [vmem:[%s296_s20] sm:$0xff]  ;;  %v303_v2 = vcombine.high %v297_v0, %v297_v0  ;;  %s1093_s20 = smov 2   ;;  %vm458_vm2 = vcmask 1041409   ;;  %vm460_vm3 = vcmask 1042434   ;;  %vm462_vm4 = vcmask 1043459   ;;  %s1101_s13 = smov 126  }
  0x19   : > { %v300_v3 = vcombine.high %v298_v1, %v298_v1  ;;  %v567_v32 = vcombine.low %v298_v1, %v298_v1  ;;  %v1242_v36 = vrot.slane %v957_v35, %v1236_v33  ;;  %v585_v39 = vld [vmem:[%s1394_s6] ss:$2 sm:$0x3]  ;;  %v609_v40 = vrot.slane %v957_v35, %v595_v37  ;;  %s1030_s16 = sshll.u32 %s1104_s15, 4  ;;  %s1031_s16 = int_to_ptr.vmem [resolvable:$false] %s1030_s16 }
  0x1a   : > { %335 = vmatprep.subr.mxu0 %v303_v2  ;;  %v571_v38 = vsel %vm569_vm1, %v303_v2, %v298_v1  ;;  %v1250_v41 = vrot.slane %v585_v39, %v1236_v33  ;;  %v956_v42 = vld [vmem:[%s1391_s3] ss:$0 sm:$0xff]  ;;  %v1256_v43 = vrot.slane %v585_v39, %v595_v37  ;;  %v1267_v47 = vsub.s32 %v1263_v44, %v1233_v31 }
  0x1b   : > { %369 = vmatprep.mubr.f32.mxu0 %v300_v3  ;;  %336 = vmatpush1.xpose.msra.mxu0 %v297_v0  ;;  %v570_v34 = vsel %vm569_vm1, %v297_v0, %v567_v32  ;;  %vm464_vm5 = vcmask 1044484   ;;  %vm466_vm6 = vcmask 1045509   ;;  %vm468_vm7 = vcmask 1046534  }
  0x1c   : > { %vm470_vm8 = vcmask 1047559   ;;  %vm473_vm9 = vcmask 31744   ;;  %vm578_vm10 = vcmask 138240   ;;  %vm660_vm11 = vcmask 277504  }
  0x1d   : > { %vm637_vm12 = vcmask 146432   ;;  %vm552_vm13 = vcmask 261120   ;;  %vm548_vm14 = vcmask 130048   ;;  %vm768_vm15 = vcmask 769024  }
  0x1e   : > { %370 = vmatmul.mubr.f32.vlgmr.msra.gmra.mxu0 %v298_v1  ;;  %vm754_vm1 = vcmask 777216  }
  0xde   : > { %v371_v6 = vpop.f32.mrf.mxu0 }
  0xdf   : > { %v385_v9 = vmul.f32 %v377_v4, %v371_v6  ;;  %v383_v10 = vmul.f32 %v375_v5, %v371_v6  ;;  %v386_v14 = vmul.f32 %v378_v7, %v371_v6  ;;  %v384_v15 = vmul.f32 %v376_v8, %v371_v6 }
  0xe0   : > { %v373_v11 = vpop.f32.mrf.mxu0  ;;  %v388_v20 = vmul.f32 %v380_v16, %v371_v6  ;;  %v387_v21 = vmul.f32 %v379_v17, %v371_v6  ;;  %v390_v26 = vmul.f32 %v382_v22, %v371_v6  ;;  %v389_v27 = vmul.f32 %v381_v23, %v371_v6 }
  0xe1   : > { %v398_v12 = vsel %vm391_vm0, %v385_v9, 0.0  ;;  %v392_v13 = vsel %vm391_vm0, %v383_v10, 0.0  ;;  %v401_v18 = vsel %vm391_vm0, %v386_v14, 0.0  ;;  %v395_v19 = vsel %vm391_vm0, %v384_v15, 0.0 }
  0xe2   : > { %399 = vadd.xlane.f32.xlu1 %v398_v12  ;;  %393 = vadd.xlane.f32.xlu0 %v392_v13  ;;  %v407_v24 = vsel %vm391_vm0, %v388_v20, 0.0  ;;  %v404_v25 = vsel %vm391_vm0, %v387_v21, 0.0  ;;  %v413_v28 = vsel %vm391_vm0, %v390_v26, 0.0  ;;  %v410_v29 = vsel %vm391_vm0, %v389_v27, 0.0 }
  0xe3   : > { %v1095_v16 = vmov 0   ;;  %vm614_vm0 = vcmask 15360  }
  0xe4   : > { %1022 = vset.pattern.permute.xlu0 %v1095_v16  ;;  %v498_v16 = vadd.s32 4294967288, %v1263_v44 }
  0xe6   : > { %402 = vadd.xlane.f32.xlu1 %v401_v18  ;;  %396 = vadd.xlane.f32.xlu0 %v395_v19 }
  0xea   : > { %408 = vadd.xlane.f32.xlu1 %v407_v24  ;;  %405 = vadd.xlane.f32.xlu0 %v404_v25 }
  0xee   : > { %414 = vadd.xlane.f32.xlu1 %v413_v28  ;;  %411 = vadd.xlane.f32.xlu0 %v410_v29 }
  0xff   : > { %574 = vrot.lane.b32.xlu1 %v570_v34, %s1088_s8 }
 0x103   : > { %656 = vrot.lane.b32.xlu1 %v1242_v36, %s1089_s14 }
 0x104   : > { %576 = vrot.lane.b32.xlu0 %v571_v38, %s1088_s8  ;;  %s1099_s8 = smov 111  }
 0x107   : > { %658 = vrot.lane.b32.xlu1 %v609_v40, %s1089_s14  ;;  %s1102_s14 = smov 127  }
 0x108   : > { %645 = vrot.lane.b32.xlu0 %v1250_v41, %s1090_s17 }
 0x10b   : > { %484 = vbcast.lane.b32.xlu1 %v956_v42, 256 }
 0x10c   : > { %633 = vrot.lane.b32.xlu0 %v1242_v36, %s1091_s18 }
 0x10f   : > { %647 = vrot.lane.b32.xlu1 %v1256_v43, %s1090_s17 }
 0x110   : > { %622 = vrot.lane.b32.xlu0 %v1250_v41, %s1092_s19 }
 0x113   : > { %635 = vrot.lane.b32.xlu1 %v609_v40, %s1091_s18 }
 0x117   : > { %624 = vrot.lane.b32.xlu1 %v1256_v43, %s1092_s19  ;;  %s284_s19 = sand.u32 1, %s1078_s25  }
 0x11b   : > { %612 = vrot.lane.b32.xlu1 %v609_v40, %s1093_s20 }
 0x16b   : > { %v400_v45 = vpop.xlane.xlu1 %399  ;;  %v394_v46 = vpop.xlane.xlu0 %393 }
 0x16c   : > { %v429_v50 = vrot.slane %v394_v46, %v1267_v47  ;;  %v437_v52 = vrot.slane %v400_v45, %v1267_v47 }
 0x16f   : > { %v403_v48 = vpop.xlane.xlu1 %402  ;;  %v397_v49 = vpop.xlane.xlu0 %396 }
 0x170   : > { %v433_v51 = vrot.slane %v397_v49, %v1267_v47  ;;  %v441_v53 = vrot.slane %v403_v48, %v1267_v47 }
 0x172   : > { %v459_v54 = vsel %vm458_vm2, %v433_v51, %v429_v50  ;;  %vm743_vm2 = vcmask 785408  }
 0x173   : > { %v461_v55 = vsel %vm460_vm3, %v437_v52, %v459_v54  ;;  %v409_v56 = vpop.xlane.xlu1 %408  ;;  %v406_v57 = vpop.xlane.xlu0 %405  ;;  %vm729_vm3 = vcmask 900096  }
 0x174   : > { %v463_v58 = vsel %vm462_vm4, %v441_v53, %v461_v55  ;;  %v445_v59 = vrot.slane %v406_v57, %v1267_v47  ;;  %v449_v60 = vrot.slane %v409_v56, %v1267_v47  ;;  %vm715_vm4 = vcmask 908288  }
 0x176   : > { %v465_v61 = vsel %vm464_vm5, %v445_v59, %v463_v58  ;;  %vm546_vm5 = vcmask 64512  }
 0x177   : > { %v415_v62 = vpop.xlane.xlu1 %414  ;;  %v412_v63 = vpop.xlane.xlu0 %411  ;;  %v467_v2 = vsel %vm466_vm6, %v449_v60, %v465_v61  ;;  %vm550_vm6 = vcmask 195584  }
 0x178   : > { %v457_v0 = vrot.slane %v415_v62, %v1267_v47  ;;  %v453_v1 = vrot.slane %v412_v63, %v1267_v47 }
 0x17a   : > { %v469_v3 = vsel %vm468_vm7, %v453_v1, %v467_v2  ;;  %v773_v1 = vld [vmem:[%s1393_s5] sm:$0xf]  ;;  %vm704_vm7 = vcmask 916480  }
 0x17b   : > { %v471_v4 = vsel %vm470_vm8, %v457_v0, %v469_v3  ;;  %v575_v5 = vpop.permute.xlu1 %574  ;;  %v577_v8 = vpop.permute.xlu0 %576  ;;  %v1103_v3 = vmov 0.0   ;;  %vm554_vm8 = vcmask 326656  }
 0x17c   : > { %v474_v6 = vsel %vm473_vm9, %v471_v4, 0.0  ;;  %v1278_v9 = vsel %vm578_vm10, %v575_v5, %v577_v8  ;;  %v1281_v12 = vsel %vm578_vm10, %v577_v8, 0.0  ;;  %v1287_v19 = vsel %vm578_vm10, 0.0, %v575_v5  ;;  %847 = vmatprep.mubr.f32.mxu1 %v1103_v3 }
 0x17d   : > { %475 = vadd.xlane.f32.xlu0 %v474_v6  ;;  %vm556_vm9 = vcmask 392192   ;;  %vm690_vm10 = vcmask 1031168  }
 0x17f   : > { %v657_v7 = vpop.permute.xlu1 %656  ;;  %v646_v18 = vpop.permute.xlu0 %645 }
 0x180   : > { %v665_v22 = vmul.f32 %v657_v7, %v1287_v19  ;;  %v653_v32 = vmul.f32 %v646_v18, %v1287_v19 }
 0x183   : > { %v659_v10 = vpop.permute.xlu1 %658  ;;  %v634_v21 = vpop.permute.xlu0 %633 }
 0x184   : > { %v661_v11 = vsel %vm660_vm11, %v657_v7, %v659_v10  ;;  %v667_v14 = vmul.f32 %v659_v10, %v1281_v12  ;;  %v642_v28 = vmul.f32 %v634_v21, %v1287_v19  ;;  %vm558_vm11 = vcmask 457728  }
 0x185   : > { %v666_v13 = vmul.f32 %v661_v11, %v1278_v9 }
 0x187   : > { %764 = vrot.lane.b32.xlu1 %v666_v13, %s1094_s21  ;;  %v485_v15 = vpop.permute.xlu1 %484  ;;  %v623_v30 = vpop.permute.xlu0 %622 }
 0x188   : > { %v630_v37 = vmul.f32 %v623_v30, %v1287_v19 }
 0x18b   : > { %766 = vrot.lane.b32.xlu1 %v667_v14, %s1094_s21  ;;  %v648_v17 = vpop.permute.xlu1 %647 }
 0x18c   : > { %v655_v23 = vmul.f32 %v648_v17, %v1281_v12  ;;  %v649_v26 = vsel %vm552_vm13, %v646_v18, %v648_v17  ;;  %v504_v17 = vadd.s32 4294967280, %v1263_v44  ;;  %v510_v18 = vadd.s32 4294967272, %v1263_v44 }
 0x18d   : > { %v654_v27 = vmul.f32 %v649_v26, %v1278_v9 }
 0x18e   : > { %v513_v26 = vsub.s32 %v510_v18, %v1233_v31 }
 0x18f   : > { %750 = vrot.lane.b32.xlu1 %v1278_v9, %s1096_s22  ;;  %v636_v20 = vpop.permute.xlu1 %635 }
 0x190   : > { %v638_v24 = vsel %vm637_vm12, %v634_v21, %v636_v20  ;;  %v644_v35 = vmul.f32 %v636_v20, %v1281_v12  ;;  %v516_v20 = vadd.s32 4294967264, %v1263_v44  ;;  %vm560_vm12 = vcmask 523264  }
 0x191   : > { %v643_v25 = vmul.f32 %v638_v24, %v1278_v9  ;;  %v522_v24 = vadd.s32 4294967256, %v1263_v44 }
 0x193   : > { %610 = vrot.lane.b32.xlu0 %v1242_v36, %s1093_s20  ;;  %748 = vrot.lane.b32.xlu1 %v1287_v19, %s1096_s22  ;;  %v625_v29 = vpop.permute.xlu1 %624  ;;  %s951_s20 = sshll.u32 %s284_s19, 3 }
 0x194   : > { %v626_v34 = vsel %vm548_vm14, %v623_v30, %v625_v29  ;;  %v632_v52 = vmul.f32 %v625_v29, %v1281_v12  ;;  %v534_v29 = vadd.s32 4294967240, %v1263_v44 }
 0x195   : > { %v631_v36 = vmul.f32 %v626_v34, %v1278_v9 }
 0x197   : > { %741 = vrot.lane.b32.xlu1 %v655_v23, %s1097_s23  ;;  %762 = vrot.lane.b32.xlu0 %v665_v22, %s1094_s21  ;;  %v613_v38 = vpop.permute.xlu1 %612  ;;  %v501_v22 = vsub.s32 %v498_v16, %v1233_v31  ;;  %v507_v23 = vsub.s32 %v504_v17, %v1233_v31  ;;  %s966_s21 = sshll.u32 %s1166_s28, 7  ;;  %s1032_s28 = scalar_lea.vmem %s1031_s16, 256 }
 0x198   : > { %v621_v39 = vmul.f32 %v613_v38, %v1281_v12 }
 0x19b   : > { %725 = vrot.lane.b32.xlu1 %v643_v25, %s1098_s29  ;;  %752 = vrot.lane.b32.xlu0 %v1281_v12, %s1096_s22  ;;  %v528_v25 = vadd.s32 4294967248, %v1263_v44  ;;  %s286_s22 = scalar_lea.vmem [#allocation2], %s951_s20 }
 0x19f   : > { %723 = vrot.lane.b32.xlu1 %v642_v28, %s1098_s29  ;;  %739 = vrot.lane.b32.xlu0 %v654_v27, %s1097_s23  ;;  %v519_v28 = vsub.s32 %v516_v20, %v1233_v31 }
 0x1a3   : > { %713 = vrot.lane.b32.xlu1 %v1281_v12, %s1099_s8  ;;  %737 = vrot.lane.b32.xlu0 %v653_v32, %s1097_s23  ;;  %s876_s23 = sshll.u32 %s286_s22, 4  ;;  %s877_s23 = int_to_ptr.vmem [resolvable:$true] %s876_s23 }
 0x1a4   : > { %p1033_p0 = scmp.lt.s32.totalorder %s877_s23, %s1031_s16 }
 0x1a7   : > { %700 = vrot.lane.b32.xlu1 %v631_v36, %s1100_s9  ;;  %727 = vrot.lane.b32.xlu0 %v644_v35, %s1098_s29  ;;  %v525_v35 = vsub.s32 %v522_v24, %v1233_v31  ;;  %v531_v36 = vsub.s32 %v528_v25, %v1233_v31 }
 0x1ab   : > { %698 = vrot.lane.b32.xlu1 %v630_v37, %s1100_s9  ;;  %711 = vrot.lane.b32.xlu0 %v1278_v9, %s1099_s8 }
 0x1af   : > { %688 = vrot.lane.b32.xlu1 %v621_v39, %s1101_s13  ;;  %709 = vrot.lane.b32.xlu0 %v1287_v19, %s1099_s8  ;;  %v540_v39 = vadd.s32 4294967232, %v1263_v44 }
 0x1b1   : > { %v543_v44 = vsub.s32 %v540_v39, %v1233_v31 }
 0x1b3   : > { %672 = vrot.lane.b32.xlu1 %v1278_v9, %s1102_s14 }
 0x1b7   : > { %670 = vrot.lane.b32.xlu1 %v1287_v19, %s1102_s14 }
 0x1f9   : > { %v765_v40 = vpop.permute.xlu1 %764 }
 0x1fd   : > { %v767_v42 = vpop.permute.xlu1 %766 }
 0x1fe   : > { %v770_v45 = vsel %vm768_vm15, %v765_v40, %v767_v42 }
 0x1ff   : > { %797 = vmatprep.subr.mxu1 %v770_v45 }
 0x201   : > { %v751_v46 = vpop.permute.xlu1 %750 }
 0x205   : > { %v749_v51 = vpop.permute.xlu1 %748 }
 0x206   : > { %v476_v48 = vpop.xlane.xlu0 %475  ;;  %v755_v59 = vsel %vm754_vm1, %v749_v51, %v751_v46 }
 0x207   : > { %v487_v49 = vadd.f32 %v485_v15, %v476_v48 }
 0x209   : > { %491 = vperm.xlu0 %1022, %v487_v49   ;;  %v742_v57 = vpop.permute.xlu1 %741 }
 0x20a   : > { %v611_v50 = vpop.permute.xlu0 %610 }
 0x20b   : > { %v615_v53 = vsel %vm614_vm0, %v611_v50, %v613_v38  ;;  %v619_v60 = vmul.f32 %v611_v50, %v1287_v19 }
 0x20c   : > { %v620_v55 = vmul.f32 %v615_v53, %v1278_v9 }
 0x20d   : > { %702 = vrot.lane.b32.xlu0 %v632_v52, %s1100_s9  ;;  %v726_v62 = vpop.permute.xlu1 %725  ;;  %s874_s9 = scalar_lea.hbm %s1395_s7, %s966_s21 }
 0x20e   : > { %v763_v54 = vpop.permute.xlu0 %762 }
 0x20f   : > { %v769_v56 = vsel %vm768_vm15, %v763_v54, %v765_v40 }
 0x210   : > { %798 = vmatpush1.msra.mxu1 %v769_v56 }
 0x211   : > { %686 = vrot.lane.b32.xlu0 %v620_v55, %s1101_s13  ;;  %v724_v5 = vpop.permute.xlu1 %723 }
 0x212   : > { %v753_v58 = vpop.permute.xlu0 %752  ;;  %v730_v7 = vsel %vm729_vm3, %v724_v5, %v726_v62 }
 0x213   : > { %v756_v61 = vsel %vm754_vm1, %v751_v46, %v753_v58  ;;  %v537_v46 = vsub.s32 %v534_v29, %v1233_v31 }
 0x214   : > { %799 = vmatprep.subr.mxu1 %v756_v61 }
 0x215   : > { %684 = vrot.lane.b32.xlu0 %v619_v60, %s1101_s13  ;;  %800 = vmatpush1.msra.mxu1 %v755_v59  ;;  %v714_v10 = vpop.permute.xlu1 %713  ;;  %s862_s13 = scalar_lea.sflag [#allocation3], %s284_s19 }
 0x216   : > { %v740_v63 = vpop.permute.xlu0 %739 }
 0x217   : > { %v745_v0 = vsel %vm743_vm2, %v740_v63, %v742_v57 }
 0x218   : > { %801 = vmatprep.subr.mxu1 %v745_v0 }
 0x219   : > { %674 = vrot.lane.b32.xlu0 %v1281_v12, %s1102_s14  ;;  %v701_v15 = vpop.permute.xlu1 %700  ;;  %s1026_s14 = scalar_lea.vmem %s877_s23, 128 }
 0x21a   : > { %v738_v2 = vpop.permute.xlu0 %737  ;;  %p1027_p11 = scmp.ne.s32.totalorder %s877_s23, %s1026_s14  ;;  %p1034_p1 = scmp.lt.s32.totalorder %s1032_s28, %s1026_s14 }
 0x21b   : > { %v744_v4 = vsel %vm743_vm2, %v738_v2, %v740_v63 }
 0x21c   : > { %802 = vmatpush1.msra.mxu1 %v744_v4  ;;  %v488_v4 = vld [vmem:[%s1392_s4] sm:$0xf]  ;;  %p1028_p12 = pnand %p1027_p11, %p1183_p5  ;;  %p1035_p2 = por %p1034_p1, %p1033_p0 }
 0x21d   : > { %776 = vperm.xlu0 %1022, %v773_v1   ;;  %v699_v21 = vpop.permute.xlu1 %698 }
 0x21e   : > { %v728_v6 = vpop.permute.xlu0 %727  ;;  %v705_v51 = vsel %vm704_vm7, %v699_v21, %v701_v15  ;;  %p1029_p13 = pneg %p1028_p12 }
 0x21f   : > { %v731_v8 = vsel %vm729_vm3, %v726_v62, %v728_v6  ;;  %v600_v6 = vmul.f32 %v1256_v43, %v1278_v9 }
 0x220   : > { %803 = vmatprep.subr.mxu1 %v731_v8  ;;  %p1036_p3 = pnand %p1035_p2, %p1029_p13 }
 0x221   : > { %804 = vmatpush1.msra.mxu1 %v730_v7  ;;  %v689_v37 = vpop.permute.xlu1 %688  ;;  %v599_v7 = vmul.f32 %v1250_v41, %v1287_v19 }
 0x222   : > { %v712_v11 = vpop.permute.xlu0 %711 }
 0x223   : > { %v717_v12 = vsel %vm715_vm4, %v712_v11, %v714_v10 }
 0x224   : > { %805 = vmatprep.subr.mxu1 %v717_v12 }
 0x225   : > { %v673_v58 = vpop.permute.xlu1 %672 }
 0x226   : > { %v710_v13 = vpop.permute.xlu0 %709 }
 0x227   : > { %v716_v14 = vsel %vm715_vm4, %v710_v13, %v712_v11 }
 0x228   : > { %806 = vmatpush1.msra.mxu1 %v716_v14 }
 0x229   : > { %v671_v1 = vpop.permute.xlu1 %670 }
 0x284   : > { %v492_v27 = vpop.permute.xlu0 %491 }
 0x285   : > { %v496_v30 = vrot.slane %v492_v27, %v1267_v47  ;;  %v502_v32 = vrot.slane %v492_v27, %v501_v22  ;;  %v508_v34 = vrot.slane %v492_v27, %v507_v23  ;;  %v514_v38 = vrot.slane %v492_v27, %v513_v26 }
 0x286   : > { %v520_v45 = vrot.slane %v492_v27, %v519_v28  ;;  %v526_v49 = vrot.slane %v492_v27, %v525_v35  ;;  %v532_v52 = vrot.slane %v492_v27, %v531_v36  ;;  %v538_v56 = vrot.slane %v492_v27, %v537_v46 }
 0x287   : > { %v547_v40 = vsel %vm546_vm5, %v496_v30, %v502_v32  ;;  %v544_v61 = vrot.slane %v492_v27, %v543_v44 }
 0x288   : > { %v703_v42 = vpop.permute.xlu0 %702  ;;  %v549_v48 = vsel %vm548_vm14, %v547_v40, %v508_v34  ;;  %vm779_vm14 = vcmask 588800  }
 0x289   : > { %v706_v47 = vsel %vm704_vm7, %v701_v15, %v703_v42  ;;  %v551_v50 = vsel %vm550_vm6, %v549_v48, %v514_v38 }
 0x28a   : > { %807 = vmatprep.subr.mxu1 %v706_v47  ;;  %v553_v53 = vsel %vm552_vm13, %v551_v50, %v520_v45  ;;  %vm676_vm13 = vcmask 1039360  }
 0x28b   : > { %808 = vmatpush1.msra.mxu1 %v705_v51  ;;  %v555_v54 = vsel %vm554_vm8, %v553_v53, %v526_v49  ;;  %v677_v5 = vsel %vm676_vm13, %v671_v1, %v673_v58 }
 0x28c   : > { %v687_v55 = vpop.permute.xlu0 %686  ;;  %v557_v57 = vsel %vm556_vm9, %v555_v54, %v532_v52 }
 0x28d   : > { %v692_v59 = vsel %vm690_vm10, %v687_v55, %v689_v37  ;;  %v559_v60 = vsel %vm558_vm11, %v557_v57, %v538_v56 }
 0x28e   : > { %809 = vmatprep.subr.mxu1 %v692_v59  ;;  %v561_v0 = vsel %vm560_vm12, %v559_v60, %v544_v61 }
 0x28f   : > { %v565_v2 = vrot.slane %v561_v0, %v1236_v33 }
 0x290   : > { %v685_v62 = vpop.permute.xlu0 %684 }
 0x291   : > { %v691_v63 = vsel %vm690_vm10, %v685_v62, %v687_v55  ;;  %v566_v8 = vmul.f32 %v565_v2, %v488_v4 }
 0x292   : > { %810 = vmatpush1.msra.mxu1 %v691_v63 }
 0x294   : > { %v675_v31 = vpop.permute.xlu0 %674 }
 0x295   : > { %v678_v3 = vsel %vm676_vm13, %v673_v58, %v675_v31 }
 0x296   : > { %811 = vmatprep.subr.mxu1 %v678_v3 }
 0x297   : > { %812 = vmatpush1.msra.mxu1 %v677_v5 }
 0x298   : > { %813 = vmatprep.subr.mxu1 %v600_v6  ;;  %v777_v33 = vpop.permute.xlu0 %776 }
 0x299   : > { %814 = vmatpush1.msra.mxu1 %v599_v7 }
 0x29a   : > { %958 = vmatmul.mubr.msk.f32.vlgmr.msra.gmra.mxu1 %vm779_vm14, %v566_v8 }
 0x35a   : > { %v849_v10 = vpop.f32.mrf.mxu1 }
 0x35b   : > { %v850_v11 = vadd.f32 %v849_v10, %v777_v33 }
 0x35c   : > { %v851_v12 = vpop.f32.mrf.mxu1 }
 0x35d   : > { %v852_v13 = vadd.f32 %v851_v12, %v777_v33  ;;  %v854_v43 = vmax.f32 %v850_v11, 0.0 }
 0x35f   : > { %v855_v9 = vmax.f32 %v852_v13, 0.0 }
 0x361   : > { %v858_v14 = vcombine.low %v854_v43, %v855_v9 }
 0x363   : > { %860 = vst [vmem:[%s286_s22] sm:$0xff] %v858_v14 }
 0x364   : > { %1039 = shalt.err (!%p1036_p3)
}
 0x365   : > { %s1040_s17 = scalar_lea.hbm %s874_s9, 128  ;;  %s1044_s20 = scalar_lea.hbm %s1395_s7, 256 }
 0x366   : > { %p1041_p4 = scmp.ne.s32.totalorder %s874_s9, %s1040_s17  ;;  %p1045_p9 = scmp.lt.s32.totalorder %s874_s9, %s1395_s7 }
 0x367   : > { %p1046_p10 = scmp.lt.s32.totalorder %s1044_s20, %s1040_s17 }
 0x368   : > { %p1042_p7 = pnand %p1041_p4, %p1183_p5 }
 0x369   : > { %p1047_p11 = por %p1046_p10, %p1045_p9 }
 0x36a   : > { %p1043_p8 = pneg %p1042_p7 }
 0x36c   : > { %p1048_p12 = pnand %p1047_p11, %p1043_p8 }
 0x36e   : > { %1051 = shalt.err (!%p1048_p12)
}
 0x36f   : > { %967 = dma.vmem_to_hbm [thread:$0]  (%p1183_p5), %s877_s23, 128, %s874_s9, %s862_s13  }
 0x370 PF: > { %p973_p13 = scmp.ge.s32.totalorder %s1086_s27, 2  ;;  %s888_s29 = sand.u32 1, %s1074_s24  }
 0x371   : > { %s889_s8 = scalar_lea.sflag [#allocation3], %s888_s29 }
 0x372   : > { %p970_p0 = pnand %p973_p13, %p1187_p6 }
 0x374   : > { %p971_p1 = pneg %p970_p0 }
 0x376   : > { %1069 = dma.done.wait (%p971_p1), %s889_s8, 128  }
 0x377   : > { %1071 = vsyncadd (%p971_p1), %s889_s8, 4294967168  ;;  %p17_p2 = scmp.ge.s32.totalorder %s1170_s30, 4   ;;  %s1398_s24 = smov %s1078_s25 }
 0x378   : > { %s1399_s25 = smov %s1082_s26  ;;  %s1400_s26 = smov %s1181_s10 }
 0x379   : > { %s1401_s27 = smov %s1170_s30  ;;  %19 = sbr.rel (!%p17_p2) target bundleno = 3 (0x3), region = 87 }
 0x37e   :  { %894 = vsyncpa [#allocation3], 1 }
 0x37f   :  { %896 = vsyncpa [#allocation3 + $0x1], 1 }

</bundles_post_ra>
